<compile_context>
chip_gen: v7x
topology: tpu7x:2x2x1
jax: 0.10.0
libtpu: 0.0.40
codegen_flags: <defaults>
</compile_context>

<pallas_src>
import functools

import jax
import jax.numpy as jnp
from jax.experimental import pallas as pl
from jax.experimental.pallas import tpu as pltpu

KH = KW = 3          # conv kernel size
CONV_OUT = 32        # conv output channels
FC1_DIM = 64         # hidden dim of first FC
EMB_DIM = 16         # embedding dimension


def _round_up(x, m):
    return (x + m - 1) // m * m


def _vmem_capacity_bytes():
    """Generation-aware VMEM query; conservative fallback (v7x per-core 64 MiB)."""
    try:
        return int(pltpu.get_tpu_info().vmem_capacity_bytes)
    except Exception:
        return 64 << 20


def _pick_tile_h(img_h, img_w, c, budget_bytes):
    """Largest row-tile whose *padded* VMEM footprint fits the budget."""
    wp = img_w + 2

    def footprint(th):
        lsrc_pad = _round_up((th + 2) * wp + 2, 128)   # streamed bf16 image tile
        lout_pad = _round_up(th * wp, 128)             # f32 conv intermediate
        img_bytes = 2 * c * lsrc_pad * 2               # x2: double buffering
        interm = 3 * CONV_OUT * lout_pad * 4           # acc + relu/mask temps
        return img_bytes + interm

    th = img_h
    while th > 1 and footprint(th) > budget_bytes:
        th -= max(1, th // 4)
    return max(1, th)


# ---------------------------------------------------------------------------
# Pallas kernel: 3x3 conv (in-kernel im2col) + ReLU + masked global-sum pool.
# Grid = (num_images, num_row_tiles); the pooled output block is the running
# accumulator across row tiles (init at k==0).
# ---------------------------------------------------------------------------
def _conv_pool_kernel(img_ref, cw_ref, cb_ref, colmask_ref, out_ref, *,
                      shifts, lout, wp, tile_h, img_h):
    """img_ref    : (1, 1, C, Lsrc) bf16 — flattened padded rows
                    [k*TH, k*TH+TH+2) of image i; lane = row*(W+2)+col.
       cw_ref     : (9, 32, C) bf16 — conv weight per (di, dj) tap (resident).
       cb_ref     : (32, 1) f32 — conv bias (resident, broadcast over lanes).
       colmask_ref: (1, Lout) f32 — 1.0 for real columns, 0.0 for pad columns.
       out_ref    : (1, 32, 1) f32 — running masked sum of ReLU(conv).
    """
    k = pl.program_id(1)

    @pl.when(k == 0)
    def _init():
        out_ref[...] = jnp.zeros_like(out_ref)

    img = img_ref[0, 0]                                    # (C, Lsrc) bf16

    # In-kernel im2col: tap (di, dj) reads flat offsets l + di*(W+2) + dj.
    acc = jnp.dot(cw_ref[0], img[:, shifts[0]:shifts[0] + lout],
                  preferred_element_type=jnp.float32)
    for s in range(1, len(shifts)):
        sh = shifts[s]
        acc = acc + jnp.dot(cw_ref[s], img[:, sh:sh + lout],
                            preferred_element_type=jnp.float32)

    h = jnp.maximum(acc + cb_ref[...], 0.0)                # (32, Lout) f32

    # Validity mask: zero out pad columns (static per-lane mask) and, for the
    # tail tile, rows beyond the real image height (lane-iota compare — no
    # vector integer div/mod needed).
    valid_rows = jnp.minimum(tile_h, img_h - k * tile_h)
    lane = jax.lax.broadcasted_iota(jnp.int32, (CONV_OUT, lout), 1)
    h = jnp.where(lane < valid_rows * wp, h, 0.0) * colmask_ref[...]

    # Partial global-pool sum; lane-axis reduce into the resident output block.
    out_ref[...] += jnp.sum(h, axis=-1, keepdims=True)[None, :, :]


# ---------------------------------------------------------------------------
# Wrapper: layout prep (XLA) + pallas_call.
# ---------------------------------------------------------------------------
def _conv_pool(x, conv_w, conv_b, tile_h=None):
    """Pooled conv features (N, 32) = mean over HxW of ReLU(conv3x3(x))."""
    n, c, img_h, img_w = x.shape
    wp = img_w + 2

    vmem_cap = _vmem_capacity_bytes()
    if tile_h is None:
        tile_h = _pick_tile_h(img_h, img_w, c, min(vmem_cap // 4, 16 << 20))
    num_tiles = pl.cdiv(img_h, tile_h)
    hpad = num_tiles * tile_h

    lout = tile_h * wp                 # output positions per tile (masked cols)
    lsrc = (tile_h + 2) * wp + 2       # +2 keeps the largest static slice in bounds

    # Host-side (XLA) prep: bf16 cast, zero pad (conv padding=1 plus tail
    # rows), and gather the overlapping (tile_h + 2)-row windows so the
    # BlockSpec blocks are disjoint.
    xb = x.astype(jnp.bfloat16)
    xp = jnp.pad(xb, ((0, 0), (0, 0), (1, hpad - img_h + 1), (1, 1)))
    row_idx = (jnp.arange(num_tiles)[:, None] * tile_h
               + jnp.arange(tile_h + 2)[None, :])          # (T, tile_h+2)
    tiles = xp[:, :, row_idx, :]                            # (N, C, T, th+2, wp)
    tiles = tiles.transpose(0, 2, 1, 3, 4).reshape(
        n, num_tiles, c, (tile_h + 2) * wp)
    tiles = jnp.pad(tiles,
                    ((0, 0), (0, 0), (0, 0), (0, lsrc - (tile_h + 2) * wp)))

    # Weights in MXU layout: (9 taps, 32 out, C in) bf16; bias (32, 1) f32.
    cw = conv_w.transpose(2, 3, 0, 1).reshape(KH * KW, CONV_OUT, c)
    cw = cw.astype(jnp.bfloat16)
    cb = conv_b.reshape(CONV_OUT, 1).astype(jnp.float32)

    # Static column mask (1.0 for real columns, 0.0 for the 2 pad columns).
    col = jnp.arange(lout, dtype=jnp.int32) % wp
    colmask = (col < img_w).astype(jnp.float32).reshape(1, lout)

    shifts = tuple(di * wp + dj for di in range(KH) for dj in range(KW))
    kernel = functools.partial(_conv_pool_kernel, shifts=shifts, lout=lout,
                               wp=wp, tile_h=tile_h, img_h=img_h)

    pooled_sum = pl.pallas_call(
        kernel,
        out_shape=jax.ShapeDtypeStruct((n, CONV_OUT, 1), jnp.float32),
        grid_spec=pltpu.PrefetchScalarGridSpec(
            num_scalar_prefetch=0,
            grid=(n, num_tiles),
            in_specs=[
                # Streamed image row-tiles: pipelined along both grid axes.
                pl.BlockSpec((1, 1, c, lsrc), lambda i, k: (i, k, 0, 0)),
                # Weights / bias / column mask: constant index maps -> resident.
                pl.BlockSpec((KH * KW, CONV_OUT, c), lambda i, k: (0, 0, 0)),
                pl.BlockSpec((CONV_OUT, 1), lambda i, k: (0, 0)),
                pl.BlockSpec((1, lout), lambda i, k: (0, 0)),
            ],
            out_specs=pl.BlockSpec((1, CONV_OUT, 1), lambda i, k: (i, 0, 0)),
        ),
        compiler_params=pltpu.CompilerParams(
            dimension_semantics=("parallel", "arbitrary"),
            vmem_limit_bytes=min(vmem_cap // 2, 64 << 20)),
    )(tiles, cw, cb, colmask)

    return pooled_sum.reshape(n, CONV_OUT) / float(img_h * img_w)


def embed(params, x, tile_h=None):
    """Embedding-net forward for x of shape (N, C, H, W) (NCHW)."""
    conv_w, conv_b, w1, b1, w2, b2 = params
    pooled = _conv_pool(x, conv_w, conv_b, tile_h=tile_h)    # (N, 32) f32
    # Finalize FCs hoisted out of the kernel (batched over N, trivial in XLA).
    e = jnp.maximum(pooled @ w1 + b1, 0.0)                   # (N, 64)
    return e @ w2 + b2                                       # (N, 16)


# ---------------------------------------------------------------------------
# SiameseNet forward semantics: one fused pallas_call for both inputs.
# ---------------------------------------------------------------------------
def siamese_forward(params, x1, x2):
    b = x1.shape[0]
    # Single fused call: weights DMA'd once; 2B images keep the v7x megacore
    # "parallel" image axis evenly split.
    emb = embed(params, jnp.concatenate([x1, x2], axis=0))
    return emb[:b], emb[b:]


def get_embedding(params, x, tile_h=None):
    # TODO(synk): with an odd/size-1 image axis one v7x TensorCore idles; if
    # single-image latency matters, shard the row-tile axis across cores and
    # combine the partial pooled sums instead.
    return embed(params, x, tile_h=tile_h)


# ---------------------------------------------------------------------------
# Pure-JAX f32 reference (for correctness validation of the kernel path).
# ---------------------------------------------------------------------------
def _reference_embed(params, x):
    conv_w, conv_b, w1, b1, w2, b2 = params
    y = jax.lax.conv_general_dilated(
        x, conv_w, window_strides=(1, 1), padding="SAME",
        dimension_numbers=("NCHW", "OIHW", "NCHW"))
    y = jnp.maximum(y + conv_b[None, :, None, None], 0.0)
    pooled = jnp.mean(y, axis=(2, 3))
    e = jnp.maximum(pooled @ w1 + b1, 0.0)
    return e @ w2 + b2


# ---------------------------------------------------------------------------
# Deterministic parameter initialization (synthetic backbone weights).
# ---------------------------------------------------------------------------
def init_params(key, in_ch):
    ks = jax.random.split(key, 6)
    conv_w = 0.1 * jax.random.normal(ks[0], (CONV_OUT, in_ch, KH, KW), jnp.float32)
    conv_b = 0.1 * jax.random.normal(ks[1], (CONV_OUT,), jnp.float32)
    w1 = 0.1 * jax.random.normal(ks[2], (CONV_OUT, FC1_DIM), jnp.float32)
    b1 = 0.1 * jax.random.normal(ks[3], (FC1_DIM,), jnp.float32)
    w2 = 0.1 * jax.random.normal(ks[4], (FC1_DIM, EMB_DIM), jnp.float32)
    b2 = 0.1 * jax.random.normal(ks[5], (EMB_DIM,), jnp.float32)
    return (conv_w, conv_b, w1, b1, w2, b2)


if __name__ == "__main__":
    key = jax.random.PRNGKey(0)
    kp, k1, k2 = jax.random.split(key, 3)

    B, C, H, W = 2, 4, 16, 16
    params = init_params(kp, C)
    x1 = jax.random.normal(k1, (B, C, H, W), jnp.float32)
    x2 = jax.random.normal(k2, (B, C, H, W), jnp.float32)

    fwd = jax.jit(siamese_forward)
    o1, o2 = fwd(params, x1, x2)
    jax.block_until_ready((o1, o2))

    g1 = jax.jit(get_embedding)(params, x1)
    jax.block_until_ready(g1)

    assert o1.shape == (B, EMB_DIM) and o2.shape == (B, EMB_DIM)
    # Fused two-image path must match the single-image embedding path.
    assert jnp.allclose(o1, g1, atol=1e-5, rtol=1e-5)

    # Multi-row-tile path (ragged tail, running-sum accumulator) must match.
    g1_tiled = jax.jit(functools.partial(get_embedding, tile_h=6))(params, x1)
    jax.block_until_ready(g1_tiled)
    assert jnp.allclose(g1, g1_tiled, atol=1e-4, rtol=1e-4)

    # bf16 conv operands vs. f32 XLA reference: loose tolerance.
    r1 = jax.jit(_reference_embed)(params, x1)
    r2 = jax.jit(_reference_embed)(params, x2)
    assert jnp.allclose(o1, r1, atol=2e-2, rtol=2e-2)
    assert jnp.allclose(o2, r2, atol=2e-2, rtol=2e-2)

    print("KERNEL_OK")
</pallas_src>

<mosaic_0001>
module attributes {stable_mosaic.version = 11 : i64} {
  func.func @_conv_pool_kernel(%arg0: i32, %arg1: i32, %arg2: memref<1x1x4x326xbf16, #tpu.memory_space<vmem>>, %arg3: memref<9x32x4xbf16, #tpu.memory_space<vmem>>, %arg4: memref<32x1xf32, #tpu.memory_space<vmem>>, %arg5: memref<1x288xf32, #tpu.memory_space<vmem>>, %arg6: memref<1x32x1xf32, #tpu.memory_space<vmem>>) attributes {dimension_semantics = [#tpu.dimension_semantics<parallel>, #tpu.dimension_semantics<arbitrary>], iteration_bounds = array<i64: 4, 1>, scalar_prefetch = 0 : i64, scratch_operands = 0 : i64, tpu.core_type = #tpu.core_type<tc>, window_params = [{transform_indices = @transform_0, window_bounds = array<i64: 1, 1, 4, 326>}, {pipeline_mode = #tpu.pipeline_mode<synchronous>, transform_indices = @transform_1, window_bounds = array<i64: 9, 32, 4>}, {pipeline_mode = #tpu.pipeline_mode<synchronous>, transform_indices = @transform_2, window_bounds = array<i64: 32, 1>}, {pipeline_mode = #tpu.pipeline_mode<synchronous>, transform_indices = @transform_3, window_bounds = array<i64: 1, 288>}, {transform_indices = @transform_4, window_bounds = array<i64: 1, 32, 1>}]} {
    %c0_i32 = arith.constant 0 : i32
    %0 = arith.cmpi eq, %arg1, %c0_i32 : i32
    %1 = arith.extui %0 : i1 to i32
    %c0_i32_0 = arith.constant 0 : i32
    %2 = arith.cmpi ne, %1, %c0_i32_0 : i32
    scf.if %2 {
      %cst_46 = arith.constant 0.000000e+00 : f32
      %72 = vector.broadcast %cst_46 : f32 to vector<1x32x1xf32>
      %c0_47 = arith.constant 0 : index
      %c0_48 = arith.constant 0 : index
      %c0_49 = arith.constant 0 : index
      %73 = vector.load %arg6[%c0_47, %c0_48, %c0_49] : memref<1x32x1xf32, #tpu.memory_space<vmem>>, vector<1x32x1xf32>
      tpu.vector_store %arg6[%c0_47, %c0_48, %c0_49], %72 {strides = array<i32>} : memref<1x32x1xf32, #tpu.memory_space<vmem>>, vector<1x32x1xf32>,
    } else {
    }
    %c0 = arith.constant 0 : index
    %c0_1 = arith.constant 0 : index
    %c0_2 = arith.constant 0 : index
    %c0_3 = arith.constant 0 : index
    %3 = vector.load %arg2[%c0, %c0_1, %c0_2, %c0_3] : memref<1x1x4x326xbf16, #tpu.memory_space<vmem>>, vector<1x1x4x326xbf16>
    %4 = vector.shape_cast %3 : vector<1x1x4x326xbf16> to vector<4x326xbf16>
    %c0_4 = arith.constant 0 : index
    %c0_5 = arith.constant 0 : index
    %c0_6 = arith.constant 0 : index
    %5 = vector.load %arg3[%c0_4, %c0_5, %c0_6] : memref<9x32x4xbf16, #tpu.memory_space<vmem>>, vector<1x32x4xbf16>
    %6 = vector.shape_cast %5 : vector<1x32x4xbf16> to vector<32x4xbf16>
    %7 = vector.extract_strided_slice %4 {offsets = [0, 0], sizes = [4, 288], strides = [1, 1]} : vector<4x326xbf16> to vector<4x288xbf16>
    %cst = arith.constant dense<0.000000e+00> : vector<32x288xf32>
    %8 = tpu.matmul %6, %7, %cst {dimension_numbers = #tpu.dot_dimension_numbers<[1], [0], [0], [1], [0, 0, 1, 1], [], []>} : vector<32x4xbf16>, vector<4x288xbf16>, vector<32x288xf32> -> vector<32x288xf32>
    %c1 = arith.constant 1 : index
    %c0_7 = arith.constant 0 : index
    %c0_8 = arith.constant 0 : index
    %9 = vector.load %arg3[%c1, %c0_7, %c0_8] : memref<9x32x4xbf16, #tpu.memory_space<vmem>>, vector<1x32x4xbf16>
    %10 = vector.shape_cast %9 : vector<1x32x4xbf16> to vector<32x4xbf16>
    %11 = vector.extract_strided_slice %4 {offsets = [0, 1], sizes = [4, 288], strides = [1, 1]} : vector<4x326xbf16> to vector<4x288xbf16>
    %cst_9 = arith.constant dense<0.000000e+00> : vector<32x288xf32>
    %12 = tpu.matmul %10, %11, %cst_9 {dimension_numbers = #tpu.dot_dimension_numbers<[1], [0], [0], [1], [0, 0, 1, 1], [], []>} : vector<32x4xbf16>, vector<4x288xbf16>, vector<32x288xf32> -> vector<32x288xf32>
    %13 = arith.addf %8, %12 : vector<32x288xf32>
    %c2 = arith.constant 2 : index
    %c0_10 = arith.constant 0 : index
    %c0_11 = arith.constant 0 : index
    %14 = vector.load %arg3[%c2, %c0_10, %c0_11] : memref<9x32x4xbf16, #tpu.memory_space<vmem>>, vector<1x32x4xbf16>
    %15 = vector.shape_cast %14 : vector<1x32x4xbf16> to vector<32x4xbf16>
    %16 = vector.extract_strided_slice %4 {offsets = [0, 2], sizes = [4, 288], strides = [1, 1]} : vector<4x326xbf16> to vector<4x288xbf16>
    %cst_12 = arith.constant dense<0.000000e+00> : vector<32x288xf32>
    %17 = tpu.matmul %15, %16, %cst_12 {dimension_numbers = #tpu.dot_dimension_numbers<[1], [0], [0], [1], [0, 0, 1, 1], [], []>} : vector<32x4xbf16>, vector<4x288xbf16>, vector<32x288xf32> -> vector<32x288xf32>
    %18 = arith.addf %13, %17 : vector<32x288xf32>
    %c3 = arith.constant 3 : index
    %c0_13 = arith.constant 0 : index
    %c0_14 = arith.constant 0 : index
    %19 = vector.load %arg3[%c3, %c0_13, %c0_14] : memref<9x32x4xbf16, #tpu.memory_space<vmem>>, vector<1x32x4xbf16>
    %20 = vector.shape_cast %19 : vector<1x32x4xbf16> to vector<32x4xbf16>
    %21 = vector.extract_strided_slice %4 {offsets = [0, 18], sizes = [4, 288], strides = [1, 1]} : vector<4x326xbf16> to vector<4x288xbf16>
    %cst_15 = arith.constant dense<0.000000e+00> : vector<32x288xf32>
    %22 = tpu.matmul %20, %21, %cst_15 {dimension_numbers = #tpu.dot_dimension_numbers<[1], [0], [0], [1], [0, 0, 1, 1], [], []>} : vector<32x4xbf16>, vector<4x288xbf16>, vector<32x288xf32> -> vector<32x288xf32>
    %23 = arith.addf %18, %22 : vector<32x288xf32>
    %c4 = arith.constant 4 : index
    %c0_16 = arith.constant 0 : index
    %c0_17 = arith.constant 0 : index
    %24 = vector.load %arg3[%c4, %c0_16, %c0_17] : memref<9x32x4xbf16, #tpu.memory_space<vmem>>, vector<1x32x4xbf16>
    %25 = vector.shape_cast %24 : vector<1x32x4xbf16> to vector<32x4xbf16>
    %26 = vector.extract_strided_slice %4 {offsets = [0, 19], sizes = [4, 288], strides = [1, 1]} : vector<4x326xbf16> to vector<4x288xbf16>
    %cst_18 = arith.constant dense<0.000000e+00> : vector<32x288xf32>
    %27 = tpu.matmul %25, %26, %cst_18 {dimension_numbers = #tpu.dot_dimension_numbers<[1], [0], [0], [1], [0, 0, 1, 1], [], []>} : vector<32x4xbf16>, vector<4x288xbf16>, vector<32x288xf32> -> vector<32x288xf32>
    %28 = arith.addf %23, %27 : vector<32x288xf32>
    %c5 = arith.constant 5 : index
    %c0_19 = arith.constant 0 : index
    %c0_20 = arith.constant 0 : index
    %29 = vector.load %arg3[%c5, %c0_19, %c0_20] : memref<9x32x4xbf16, #tpu.memory_space<vmem>>, vector<1x32x4xbf16>
    %30 = vector.shape_cast %29 : vector<1x32x4xbf16> to vector<32x4xbf16>
    %31 = vector.extract_strided_slice %4 {offsets = [0, 20], sizes = [4, 288], strides = [1, 1]} : vector<4x326xbf16> to vector<4x288xbf16>
    %cst_21 = arith.constant dense<0.000000e+00> : vector<32x288xf32>
    %32 = tpu.matmul %30, %31, %cst_21 {dimension_numbers = #tpu.dot_dimension_numbers<[1], [0], [0], [1], [0, 0, 1, 1], [], []>} : vector<32x4xbf16>, vector<4x288xbf16>, vector<32x288xf32> -> vector<32x288xf32>
    %33 = arith.addf %28, %32 : vector<32x288xf32>
    %c6 = arith.constant 6 : index
    %c0_22 = arith.constant 0 : index
    %c0_23 = arith.constant 0 : index
    %34 = vector.load %arg3[%c6, %c0_22, %c0_23] : memref<9x32x4xbf16, #tpu.memory_space<vmem>>, vector<1x32x4xbf16>
    %35 = vector.shape_cast %34 : vector<1x32x4xbf16> to vector<32x4xbf16>
    %36 = vector.extract_strided_slice %4 {offsets = [0, 36], sizes = [4, 288], strides = [1, 1]} : vector<4x326xbf16> to vector<4x288xbf16>
    %cst_24 = arith.constant dense<0.000000e+00> : vector<32x288xf32>
    %37 = tpu.matmul %35, %36, %cst_24 {dimension_numbers = #tpu.dot_dimension_numbers<[1], [0], [0], [1], [0, 0, 1, 1], [], []>} : vector<32x4xbf16>, vector<4x288xbf16>, vector<32x288xf32> -> vector<32x288xf32>
    %38 = arith.addf %33, %37 : vector<32x288xf32>
    %c7 = arith.constant 7 : index
    %c0_25 = arith.constant 0 : index
    %c0_26 = arith.constant 0 : index
    %39 = vector.load %arg3[%c7, %c0_25, %c0_26] : memref<9x32x4xbf16, #tpu.memory_space<vmem>>, vector<1x32x4xbf16>
    %40 = vector.shape_cast %39 : vector<1x32x4xbf16> to vector<32x4xbf16>
    %41 = vector.extract_strided_slice %4 {offsets = [0, 37], sizes = [4, 288], strides = [1, 1]} : vector<4x326xbf16> to vector<4x288xbf16>
    %cst_27 = arith.constant dense<0.000000e+00> : vector<32x288xf32>
    %42 = tpu.matmul %40, %41, %cst_27 {dimension_numbers = #tpu.dot_dimension_numbers<[1], [0], [0], [1], [0, 0, 1, 1], [], []>} : vector<32x4xbf16>, vector<4x288xbf16>, vector<32x288xf32> -> vector<32x288xf32>
    %43 = arith.addf %38, %42 : vector<32x288xf32>
    %c8 = arith.constant 8 : index
    %c0_28 = arith.constant 0 : index
    %c0_29 = arith.constant 0 : index
    %44 = vector.load %arg3[%c8, %c0_28, %c0_29] : memref<9x32x4xbf16, #tpu.memory_space<vmem>>, vector<1x32x4xbf16>
    %45 = vector.shape_cast %44 : vector<1x32x4xbf16> to vector<32x4xbf16>
    %46 = vector.extract_strided_slice %4 {offsets = [0, 38], sizes = [4, 288], strides = [1, 1]} : vector<4x326xbf16> to vector<4x288xbf16>
    %cst_30 = arith.constant dense<0.000000e+00> : vector<32x288xf32>
    %47 = tpu.matmul %45, %46, %cst_30 {dimension_numbers = #tpu.dot_dimension_numbers<[1], [0], [0], [1], [0, 0, 1, 1], [], []>} : vector<32x4xbf16>, vector<4x288xbf16>, vector<32x288xf32> -> vector<32x288xf32>
    %48 = arith.addf %43, %47 : vector<32x288xf32>
    %c0_31 = arith.constant 0 : index
    %c0_32 = arith.constant 0 : index
    %49 = vector.load %arg4[%c0_31, %c0_32] : memref<32x1xf32, #tpu.memory_space<vmem>>, vector<32x1xf32>
    %50 = vector.broadcast %49 : vector<32x1xf32> to vector<32x288xf32>
    %51 = arith.addf %48, %50 : vector<32x288xf32>
    %cst_33 = arith.constant 0.000000e+00 : f32
    %52 = vector.broadcast %cst_33 : f32 to vector<32x288xf32>
    %53 = arith.maximumf %51, %52 : vector<32x288xf32>
    %c16_i32 = arith.constant 16 : i32
    %54 = arith.muli %arg1, %c16_i32 : i32
    %c16_i32_34 = arith.constant 16 : i32
    %55 = arith.subi %c16_i32_34, %54 : i32
    %c16_i32_35 = arith.constant 16 : i32
    %56 = arith.minsi %c16_i32_35, %55 : i32
    %57 = tpu.iota {dimensions = array<i32: 1>} : vector<32x288xi32>
    %c18_i32 = arith.constant 18 : i32
    %58 = arith.muli %56, %c18_i32 : i32
    %59 = vector.broadcast %58 : i32 to vector<32x288xi32>
    %60 = arith.cmpi slt, %57, %59 : vector<32x288xi32>
    %cst_36 = arith.constant 0.000000e+00 : f32
    %61 = vector.broadcast %cst_36 : f32 to vector<32x288xf32>
    %62 = arith.select %60, %53, %61 : vector<32x288xi1>, vector<32x288xf32>
    %c0_37 = arith.constant 0 : index
    %c0_38 = arith.constant 0 : index
    %63 = vector.load %arg5[%c0_37, %c0_38] : memref<1x288xf32, #tpu.memory_space<vmem>>, vector<1x288xf32>
    %64 = vector.broadcast %63 : vector<1x288xf32> to vector<32x288xf32>
    %65 = arith.mulf %62, %64 : vector<32x288xf32>
    %c0_39 = arith.constant 0 : index
    %c0_40 = arith.constant 0 : index
    %c0_41 = arith.constant 0 : index
    %66 = vector.load %arg6[%c0_39, %c0_40, %c0_41] : memref<1x32x1xf32, #tpu.memory_space<vmem>>, vector<1x32x1xf32>
    %cst_42 = arith.constant dense<0.000000e+00> : vector<32xf32>
    %67 = vector.multi_reduction <add>, %65, %cst_42 [1] : vector<32x288xf32> to vector<32xf32>
    %68 = vector.shape_cast %67 : vector<32xf32> to vector<32x1xf32>
    %69 = vector.shape_cast %68 : vector<32x1xf32> to vector<1x32x1xf32>
    %70 = arith.addf %66, %69 : vector<1x32x1xf32>
    %c0_43 = arith.constant 0 : index
    %c0_44 = arith.constant 0 : index
    %c0_45 = arith.constant 0 : index
    %71 = vector.load %arg6[%c0_43, %c0_44, %c0_45] : memref<1x32x1xf32, #tpu.memory_space<vmem>>, vector<1x32x1xf32>
    tpu.vector_store %arg6[%c0_43, %c0_44, %c0_45], %70 {strides = array<i32>} : memref<1x32x1xf32, #tpu.memory_space<vmem>>, vector<1x32x1xf32>,
    return
  }
  func.func @transform_0(%arg0: i32, %arg1: i32) -> (i32, i32, i32, i32) {
    %c0_i32 = arith.constant 0 : i32
    %c0_i32_0 = arith.constant 0 : i32
    %c0_i32_1 = arith.constant 0 : i32
    return %arg0, %arg1, %c0_i32, %c0_i32_0 : i32, i32, i32, i32
  }
  func.func @transform_1(%arg0: i32, %arg1: i32) -> (i32, i32, i32) {
    %c0_i32 = arith.constant 0 : i32
    %c0_i32_0 = arith.constant 0 : i32
    %c0_i32_1 = arith.constant 0 : i32
    %c0_i32_2 = arith.constant 0 : i32
    return %c0_i32, %c0_i32_0, %c0_i32_1 : i32, i32, i32
  }
  func.func @transform_2(%arg0: i32, %arg1: i32) -> (i32, i32) {
    %c0_i32 = arith.constant 0 : i32
    %c0_i32_0 = arith.constant 0 : i32
    %c0_i32_1 = arith.constant 0 : i32
    return %c0_i32, %c0_i32_0 : i32, i32
  }
  func.func @transform_3(%arg0: i32, %arg1: i32) -> (i32, i32) {
    %c0_i32 = arith.constant 0 : i32
    %c0_i32_0 = arith.constant 0 : i32
    %c0_i32_1 = arith.constant 0 : i32
    return %c0_i32, %c0_i32_0 : i32, i32
  }
  func.func @transform_4(%arg0: i32, %arg1: i32) -> (i32, i32, i32) {
    %c0_i32 = arith.constant 0 : i32
    %c0_i32_0 = arith.constant 0 : i32
    %c0_i32_1 = arith.constant 0 : i32
    return %arg0, %c0_i32, %c0_i32_0 : i32, i32, i32
  }
}

</mosaic_0001>

<bundles_post_ra>
// kernel: siamese_forward.1
= control target key start
LH: loop header
LB: loop body
LE: loop exit
PB: predicated region body
PF: predicated region fallthrough
CT: control target
= control target key end

     0   :  { %s2214_s15 = smov 0   ;;  %s2216_s16 = smov 0   ;;  %s2525_s0 = inlined_call_operand.vmem [shape: bf16[4,1,4,326], index: 0, kind: input, shape index: {}]   ;;  %s2526_s1 = inlined_call_operand.vmem [shape: bf16[9,32,4], index: 1, kind: input, shape index: {}]   ;;  %s2527_s2 = inlined_call_operand.vmem [shape: f32[32,1], index: 2, kind: input, shape index: {}]   ;;  %s2528_s3 = inlined_call_operand.vmem [shape: f32[1,288], index: 3, kind: input, shape index: {}]   ;;  %s2529_s4 = inlined_call_operand.vmem [shape: f32[4,32,1], index: 4, kind: output, shape index: {}]  }
   0x1   :  { %s2218_s17 = smov 0  }
   0x2 LB: > { %s26_s18 = sadd.s32 1, %s2172_s16  ;;  %p1809_p0 = scmp.ge.s32.totalorder %s2176_s17, 1  ;;  %s2176_s17 = sphi %s2218_s17, %s14_s17   ;;  %s2172_s16 = sphi %s2216_s16, %s2531_s16   ;;  %s2168_s15 = sphi %s2214_s15, %s2530_s15  }
   0x3   : > { %p28_p1 = scmp.ge.s32.totalorder %s26_s18, 4  ;;  %p180_p2 = scmp.lt.s32.totalorder %s2176_s17, 5 }
   0x5   : > { %s2533_s18 = smov (%p28_p1, %s26_s18), 0  ;;  %p181_p3 = pnand %p1809_p0, %p180_p2 }
   0x6   : > { %p210_p4 = scmp.lt.s32.totalorder (!%p181_p3), %s2168_s15, 3  ;;  %v259_v0 = vlaneseq (!%p181_p3)  ;;  %v2178_v1 = vmov (!%p181_p3), 1983009808   ;;  %v2179_v6 = vmov (!%p181_p3), 0   ;;  %s2180_s23 = smov (!%p181_p3), 127   ;;  %vm277_vm0 = vcmask (!%p181_p3), 1039360  }
   0x7   : > { %184 = sbr.rel (%p181_p3) target bundleno = 643 (0x283), region = 36  ;;  %v257_v2 = vunpack.c.l.s4 (!%p181_p3), %v2178_v1  ;;  %329 = vmatprep.mubr.bf16.mxu1 (!%p181_p3), %v2179_v6  ;;  %597 = vmatprep.mubr.bf16.mxu0 (!%p181_p3), %v2179_v6  ;;  %s2181_s24 = smov (!%p181_p3), 126   ;;  %vm287_vm1 = vcmask (!%p181_p3), 1041408   ;;  %v2136_v19 = vld [vmem:[%s2526_s1 + $0x10] sm:$0xff] (!%p181_p3)   ;;  %vm547_vm2 = vcmask (!%p181_p3), 1031168   ;;  %v1597_v20 = vld [vmem:[%s2527_s2] sm:$0xff] (!%p181_p3) }
   0x8   : > { %v2235_v3 = vshrl.u32 (!%p181_p3), %v259_v0, 7  ;;  %2133 = vset.pattern.permute.xlu0 (!%p181_p3), %v2179_v6  ;;  %2134 = vset.pattern.permute.xlu1 (!%p181_p3), %v2179_v6  ;;  %s2182_s25 = smov (!%p181_p3), 110   ;;  %s2183_s26 = smov (!%p181_p3), 109   ;;  %v1598_v21 = vld [vmem:[%s2527_s2 + $0x8] sm:$0xff] (!%p181_p3)  ;;  %vm280_vm3 = vcmask (!%p181_p3), 31744   ;;  %v1599_v27 = vld [vmem:[%s2527_s2 + $0x10] sm:$0xff] (!%p181_p3) }
   0x9   : > { %v258_v4 = vunpack.c.0.s8 (!%p181_p3), %v257_v2  ;;  %s2184_s27 = smov (!%p181_p3), 108   ;;  %s2185_s28 = smov (!%p181_p3), 92   ;;  %v1600_v29 = vld [vmem:[%s2527_s2 + $0x18] sm:$0xff] (!%p181_p3)  ;;  %v2309_v30 = vld [vmem:[%s2526_s1 + $0x20] sm:$0xff] (!%p181_p3)   ;;  %vm700_vm4 = vcmask (!%p181_p3), 900096   ;;  %v2329_v39 = vld [vmem:[%s2526_s1 + $0x28] sm:$0xff] (!%p181_p3)  }
   0xa   : > { %s2186_s29 = smov (!%p181_p3), 91   ;;  %s2187_s30 = smov (!%p181_p3), 90   ;;  %v2138_v32 = vld [vmem:[%s2526_s1 + $0x18] sm:$0xff] (!%p181_p3)   ;;  %vm853_vm5 = vcmask (!%p181_p3), 891904   ;;  %v2140_v46 = vld [vmem:[%s2526_s1 + $0x30] sm:$0xff] (!%p181_p3)   ;;  %vm1006_vm6 = vcmask (!%p181_p3), 883712  }
   0xb   : > { %v261_v5 = vsub.s32 (!%p181_p3), %v258_v4, %v2235_v3  ;;  %v2141_v49 = vld [vmem:[%s2526_s1] sm:$0xff] (!%p181_p3)   ;;  %v2142_v53 = vld [vmem:[%s2526_s1 + $0x38] sm:$0xff] (!%p181_p3)   ;;  %v2143_v54 = vld [vmem:[%s2526_s1 + $0x8] sm:$0xff] (!%p181_p3)   ;;  %vm1159_vm7 = vcmask (!%p181_p3), 752640   ;;  %vm1312_vm8 = vcmask (!%p181_p3), 744448   ;;  %vm1465_vm9 = vcmask (!%p181_p3), 736256  }
   0xc   : > { %v2144_v57 = vld [vmem:[%s2526_s1 + $0x40] sm:$0xff] (!%p181_p3)   ;;  %v2145_v63 = vld [vmem:[%s2526_s1 + $0x48] sm:$0xff] (!%p181_p3)   ;;  %v2146_v4 = vld [vmem:[%s2526_s1 + $0x50] sm:$0xff] (!%p181_p3)   ;;  %vm229_vm10 = vcmask (!%p181_p3), 7168   ;;  %vm1704_vm12 = vcmask (!%p181_p3), 261120  }
   0xe   : > { %s2535_s15 = smov (!%p210_p4, %s2168_s15), 3 }
   0xf   : > { %s2097_s19 = smul.u32 6, %s2535_s15  ;;  %s1910_s5 = sshll.u32 %s2535_s15, 5 }
  0x10   : > { %s2483_s8 = scalar_lea.vmem %s2529_s4, %s1910_s5 }
  0x11   : > { %s218_s22 = scalar_lea.vmem %s2525_s0, %s2097_s19 }
  0x12   : > { %v234_v7 = vld [vmem:[%s218_s22] sm:$0x3f] }
  0x13   : > { %v2246_v8 = vrot.slane %v234_v7, %v261_v5  ;;  %v255_v9 = vcombine.high %v234_v7, %v234_v7 }
  0x15   : > { %271 = vrot.lane.b32.xlu0 %v2246_v8, %s2180_s23  ;;  %v2249_v10 = vrot.slane %v255_v9, %v261_v5  ;;  %v2253_v11 = vcombine.high %v2246_v8, %v2246_v8  ;;  %v416_v43 = vsel %vm287_vm1, %v2246_v8, 0 }
  0x17   : > { %275 = vrot.lane.b32.xlu1 %v2249_v10, %s2180_s23  ;;  %v422_v52 = vsel %vm287_vm1, %v2249_v10, 0 }
  0x19   : > { %273 = vrot.lane.b32.xlu0 %v2253_v11, %s2180_s23 }
  0x1b   : > { %541 = vrot.lane.b32.xlu1 %v2246_v8, %s2181_s24 }
  0x1d   : > { %543 = vrot.lane.b32.xlu0 %v2253_v11, %s2181_s24 }
  0x1f   : > { %545 = vrot.lane.b32.xlu1 %v2249_v10, %s2181_s24 }
  0x21   : > { %694 = vrot.lane.b32.xlu0 %v2246_v8, %s2182_s25 }
  0x23   : > { %696 = vrot.lane.b32.xlu1 %v2253_v11, %s2182_s25 }
  0x25   : > { %698 = vrot.lane.b32.xlu0 %v2249_v10, %s2182_s25 }
  0x27   : > { %847 = vrot.lane.b32.xlu1 %v2246_v8, %s2183_s26 }
  0x29   : > { %849 = vrot.lane.b32.xlu0 %v2253_v11, %s2183_s26 }
  0x2b   : > { %851 = vrot.lane.b32.xlu1 %v2249_v10, %s2183_s26 }
  0x2d   : > { %1000 = vrot.lane.b32.xlu0 %v2246_v8, %s2184_s27 }
  0x2f   : > { %1002 = vrot.lane.b32.xlu1 %v2253_v11, %s2184_s27 }
  0x31   : > { %1004 = vrot.lane.b32.xlu0 %v2249_v10, %s2184_s27 }
  0x33   : > { %1153 = vrot.lane.b32.xlu1 %v2246_v8, %s2185_s28 }
  0x35   : > { %1155 = vrot.lane.b32.xlu0 %v2253_v11, %s2185_s28 }
  0x37   : > { %1157 = vrot.lane.b32.xlu1 %v2249_v10, %s2185_s28 }
  0x39   : > { %1306 = vrot.lane.b32.xlu0 %v2246_v8, %s2186_s29 }
  0x3b   : > { %1308 = vrot.lane.b32.xlu1 %v2253_v11, %s2186_s29 }
  0x3d   : > { %1310 = vrot.lane.b32.xlu0 %v2249_v10, %s2186_s29 }
  0x3f   : > { %1459 = vrot.lane.b32.xlu1 %v2246_v8, %s2187_s30 }
  0x41   : > { %1461 = vrot.lane.b32.xlu0 %v2253_v11, %s2187_s30 }
  0x43   : > { %1463 = vrot.lane.b32.xlu1 %v2249_v10, %s2187_s30 }
  0x45   : > { %1603 = vperm.xlu0 %2133, %v1597_v20   ;;  %v2149_v20 = vld [vmem:[%s2526_s1 + $0x68] sm:$0xff]  }
  0x47   : > { %1608 = vperm.xlu1 %2134, %v1598_v21  }
  0x49   : > { %1618 = vperm.xlu0 %2133, %v1600_v29   ;;  %v2153_v29 = vld [vmem:[%s2526_s1 + $0x88] sm:$0xff]  }
  0x4b   : > { %1613 = vperm.xlu1 %2134, %v1599_v27   ;;  %v2152_v27 = vld [vmem:[%s2526_s1 + $0x80] sm:$0xff]  }
  0x87   : > { %v272_v12 = vpop.permute.xlu0 %271 }
  0x89   : > { %v276_v13 = vpop.permute.xlu1 %275 }
  0x8a   : > { %v295_v25 = vsel %vm287_vm1, %v276_v13, 0 }
  0x8b   : > { %v274_v14 = vpop.permute.xlu0 %273 }
  0x8c   : > { %v279_v15 = vsel %vm277_vm0, %v274_v14, %v276_v13  ;;  %v278_v16 = vsel %vm277_vm0, %v272_v12, %v274_v14 }
  0x8d   : > { %1819 = vmatprep.subr.msk.bf16.mxu1 %vm287_vm1, %v279_v15  ;;  %v542_v17 = vpop.permute.xlu1 %541  ;;  %v289_v18 = vsel %vm287_vm1, %v278_v16, 0  ;;  %v2148_v15 = vld [vmem:[%s2526_s1 + $0x60] sm:$0xff]  }
  0x8e   : > { %298 = vmatpush1.bf16.msra.mxu1 %v289_v18 }
  0x8f   : > { %2088 = vmatprep.subr.msk.bf16.mxu1 %vm287_vm1, %v276_v13  ;;  %v544_v22 = vpop.permute.xlu0 %543 }
  0x90   : > { %v548_v23 = vsel %vm547_vm2, %v542_v17, %v544_v22 }
  0x91   : > { %1820 = vmatmul.mubr.msk.bf16.vlgmr.msra.gmra.mrb[0].mxu1 %vm280_vm3, %v2136_v19  ;;  %v2292_v24 = vpop.permute.xlu1 %545  ;;  %v557_v26 = vsel %vm287_vm1, %v548_v23, 0  ;;  %v2150_v23 = vld [vmem:[%s2526_s1 + $0x70] sm:$0xff]  }
  0x92   : > { %1939 = vmatpush3.bf16.msra.mxu1 %v295_v25  ;;  %v549_v28 = vsel %vm547_vm2, %v544_v22, %v2292_v24  ;;  %339 = vmatprep.mubr.bf16.mxu1 %v2179_v6  ;;  %v563_v62 = vsel %vm287_vm1, %v2292_v24, 0 }
  0x93   : > { %1837 = vmatprep.subr.msk.bf16.mxu0 %vm287_vm1, %v549_v28  ;;  %v695_v31 = vpop.permute.xlu0 %694  ;;  %1826 = vmatprep.subr.msk.bf16.mxu1 %vm287_vm1, %v2253_v11  ;;  %v2147_v11 = vld [vmem:[%s2526_s1 + $0x58] sm:$0xff]  }
  0x94   : > { %566 = vmatpush1.bf16.msra.mxu0 %v557_v26  ;;  %v2151_v26 = vld [vmem:[%s2526_s1 + $0x78] sm:$0xff]  }
  0x95   : > { %v697_v33 = vpop.permute.xlu1 %696 }
  0x96   : > { %v701_v34 = vsel %vm700_vm4, %v695_v31, %v697_v33 }
  0x97   : > { %1838 = vmatmul.mubr.msk.bf16.vlgmr.msra.gmra.mrb[0].mxu0 %vm280_vm3, %v2309_v30  ;;  %v2318_v35 = vpop.permute.xlu0 %698  ;;  %v710_v36 = vsel %vm287_vm1, %v701_v34, 0 }
  0x98   : > { %607 = vmatprep.mubr.bf16.mxu0 %v2179_v6  ;;  %v702_v37 = vsel %vm700_vm4, %v697_v33, %v2318_v35  ;;  %v716_v8 = vsel %vm287_vm1, %v2318_v35, 0 }
  0x99   : > { %1821 = vmatmul.mubr.msk.bf16.gmra.mrb[4].mxu1 %vm280_vm3, %v2138_v32  ;;  %1848 = vmatprep.subr.msk.bf16.mxu0 %vm287_vm1, %v702_v37  ;;  %v848_v38 = vpop.permute.xlu1 %847 }
  0x9a   : > { %1940 = vmatprep.mubr.msk.bf16.mxu1 %vm280_vm3, %v2136_v19  ;;  %719 = vmatpush1.bf16.msra.mxu0 %v710_v36 }
  0x9b   : > { %v850_v40 = vpop.permute.xlu0 %849 }
  0x9c   : > { %v854_v45 = vsel %vm853_vm5, %v848_v38, %v850_v40 }
  0x9d   : > { %v2331_v41 = vpop.permute.xlu1 %851  ;;  %v863_v50 = vsel %vm287_vm1, %v854_v45, 0 }
  0x9e   : > { %v855_v42 = vsel %vm853_vm5, %v850_v40, %v2331_v41  ;;  %v869_v13 = vsel %vm287_vm1, %v2331_v41, 0 }
  0x9f   : > { %1839 = vmatmul.mubr.msk.bf16.gmra.mrb[4].mxu0 %vm280_vm3, %v2329_v39  ;;  %1859 = vmatprep.subr.msk.bf16.mxu0 %vm287_vm1, %v855_v42  ;;  %v1001_v44 = vpop.permute.xlu0 %1000  ;;  %v1670_v42 = vld [vmem:[%s2528_s3] sm:$0x7] }
  0xa0   : > { %750 = vmatprep.mubr.bf16.mxu0 %v2179_v6 }
  0xa1   : > { %1941 = vmatmul.mubr.msk.bf16.vlgmr.msra.gmra.mrb[8].mxu1 %vm280_vm3, %v2138_v32  ;;  %v1003_v48 = vpop.permute.xlu1 %1002 }
  0xa2   : > { %425 = vmatpush1.bf16.msra.mxu1 %v416_v43  ;;  %456 = vmatprep.mubr.bf16.mxu1 %v2179_v6  ;;  %v1007_v56 = vsel %vm1006_vm6, %v1001_v44, %v1003_v48  ;;  %v1678_v43 = vsub.s32 1, %v2235_v3 }
  0xa3   : > { %2089 = vmatprep.subr.msk.bf16.mxu1 %vm287_vm1, %v2249_v10  ;;  %v2347_v47 = vpop.permute.xlu0 %1004  ;;  %v1016_v60 = vsel %vm287_vm1, %v1007_v56, 0 }
  0xa4   : > { %v1008_v51 = vsel %vm1006_vm6, %v1003_v48, %v2347_v47  ;;  %v1022_v21 = vsel %vm287_vm1, %v2347_v47, 0 }
  0xa5   : > { %v1154_v55 = vpop.permute.xlu1 %1153 }
  0xa7   : > { %1849 = vmatmul.mubr.msk.bf16.vlgmr.msra.gmra.mrb[0].mxu0 %vm280_vm3, %v2140_v46  ;;  %v1156_v58 = vpop.permute.xlu0 %1155 }
  0xa8   : > { %760 = vmatprep.mubr.bf16.mxu0 %v2179_v6  ;;  %872 = vmatpush1.bf16.msra.mxu0 %v863_v50  ;;  %v1160_v2 = vsel %vm1159_vm7, %v1154_v55, %v1156_v58  ;;  %v1679_v55 = vrot.slane %v1670_v42, %v1678_v43 }
  0xa9   : > { %1827 = vmatmul.mubr.msk.bf16.vlgmr.msra.gmra.mrb[0].mxu1 %vm280_vm3, %v2141_v49  ;;  %1870 = vmatprep.subr.msk.bf16.mxu0 %vm287_vm1, %v1008_v51  ;;  %v2378_v59 = vpop.permute.xlu1 %1157  ;;  %v1169_v9 = vsel %vm287_vm1, %v1160_v2, 0 }
  0xaa   : > { %1945 = vmatpush3.bf16.msra.mxu1 %v422_v52  ;;  %466 = vmatprep.mubr.bf16.mxu1 %v2179_v6  ;;  %v1161_v61 = vsel %vm1159_vm7, %v1156_v58, %v2378_v59  ;;  %v1175_v25 = vsel %vm287_vm1, %v2378_v59, 0 }
  0xab   : > { %2090 = vmatprep.subr.msk.bf16.mxu1 %vm287_vm1, %v2292_v24  ;;  %v1307_v1 = vpop.permute.xlu0 %1306 }
  0xad   : > { %v1309_v7 = vpop.permute.xlu1 %1308 }
  0xae   : > { %v1313_v14 = vsel %vm1312_vm8, %v1307_v1, %v1309_v7 }
  0xaf   : > { %1850 = vmatmul.mubr.msk.bf16.gmra.mrb[4].mxu0 %vm280_vm3, %v2142_v53  ;;  %v1311_v5 = vpop.permute.xlu0 %1310  ;;  %v1322_v18 = vsel %vm287_vm1, %v1313_v14, 0 }
  0xb0   : > { %903 = vmatprep.mubr.bf16.mxu0 %v2179_v6  ;;  %v1314_v10 = vsel %vm1312_vm8, %v1309_v7, %v1311_v5  ;;  %v1328_v28 = vsel %vm287_vm1, %v1311_v5, 0 }
  0xb1   : > { %1828 = vmatmul.mubr.msk.bf16.gmra.mrb[4].mxu1 %vm280_vm3, %v2143_v54  ;;  %v1460_v12 = vpop.permute.xlu1 %1459 }
  0xb2   : > { %1946 = vmatprep.mubr.msk.bf16.mxu1 %vm280_vm3, %v2141_v49 }
  0xb3   : > { %v1462_v16 = vpop.permute.xlu0 %1461 }
  0xb4   : > { %v1466_v22 = vsel %vm1465_vm9, %v1460_v12, %v1462_v16 }
  0xb5   : > { %v1464_v17 = vpop.permute.xlu1 %1463  ;;  %v1475_v24 = vsel %vm287_vm1, %v1466_v22, 0 }
  0xb6   : > { %v1467_v19 = vsel %vm1465_vm9, %v1462_v16, %v1464_v17 }
  0xb7   : > { %1860 = vmatmul.mubr.msk.bf16.vlgmr.msra.gmra.mrb[0].mxu0 %vm280_vm3, %v2144_v57 }
  0xb8   : > { %913 = vmatprep.mubr.bf16.mxu0 %v2179_v6  ;;  %1025 = vmatpush1.bf16.msra.mxu0 %v1016_v60 }
  0xb9   : > { %1947 = vmatmul.mubr.msk.bf16.vlgmr.msra.gmra.mrb[8].mxu1 %vm280_vm3, %v2143_v54  ;;  %1881 = vmatprep.subr.msk.bf16.mxu0 %vm287_vm1, %v1161_v61 }
  0xba   : > { %1951 = vmatpush3.bf16.msra.mxu1 %v563_v62  ;;  %1952 = vmatprep.mubr.msk.bf16.mxu1 %vm280_vm3, %v2309_v30  ;;  %v1481_v30 = vsel %vm287_vm1, %v1464_v17, 0 }
  0xbb   : > { %2091 = vmatprep.subr.msk.bf16.mxu1 %vm287_vm1, %v2318_v35 }
  0xbf   : > { %1861 = vmatmul.mubr.msk.bf16.gmra.mrb[4].mxu0 %vm280_vm3, %v2145_v63 }
  0xc0   : > { %1056 = vmatprep.mubr.bf16.mxu0 %v2179_v6 }
  0xc5   : > { %1953 = vmatmul.mubr.msk.bf16.vlgmr.msra.gmra.mrb[8].mxu1 %vm280_vm3, %v2329_v39  ;;  %v1674_v39 = vsub.s32 0, %v2235_v3 }
  0xc6   : > { %1957 = vmatpush3.bf16.msra.mxu1 %v716_v8  ;;  %1958 = vmatprep.mubr.msk.bf16.mxu1 %vm280_vm3, %v2140_v46  ;;  %v1609_v48 = vpop.permute.xlu1 %1608 }
  0xc7   : > { %2092 = vmatprep.subr.msk.bf16.mxu1 %vm287_vm1, %v2331_v41  ;;  %1871 = vmatmul.mubr.msk.bf16.vlgmr.msra.gmra.mrb[0].mxu0 %vm280_vm3, %v2146_v4  ;;  %v1604_v41 = vpop.permute.xlu0 %1603  ;;  %v1675_v52 = vrot.slane %v1670_v42, %v1674_v39 }
  0xc8   : > { %1066 = vmatprep.mubr.bf16.mxu0 %v2179_v6  ;;  %1178 = vmatpush1.bf16.msra.mxu0 %v1169_v9 }
  0xc9   : > { %1892 = vmatprep.subr.msk.bf16.mxu0 %vm287_vm1, %v1314_v10 }
  0xca   : > { %v1614_v1 = vpop.permute.xlu1 %1613 }
  0xcb   : > { %v1619_v10 = vpop.permute.xlu0 %1618 }
  0xcf   : > { %1872 = vmatmul.mubr.msk.bf16.gmra.mrb[4].mxu0 %vm280_vm3, %v2147_v11 }
  0xd0   : > { %1209 = vmatprep.mubr.bf16.mxu0 %v2179_v6 }
  0xd1   : > { %1959 = vmatmul.mubr.msk.bf16.vlgmr.msra.gmra.mrb[8].mxu1 %vm280_vm3, %v2142_v53 }
  0xd2   : > { %1963 = vmatpush3.bf16.msra.mxu1 %v869_v13  ;;  %1964 = vmatprep.mubr.msk.bf16.mxu1 %vm280_vm3, %v2144_v57 }
  0xd3   : > { %2093 = vmatprep.subr.msk.bf16.mxu1 %vm287_vm1, %v2347_v47 }
  0xd7   : > { %1882 = vmatmul.mubr.msk.bf16.vlgmr.msra.gmra.mrb[0].mxu0 %vm280_vm3, %v2148_v15 }
  0xd8   : > { %1219 = vmatprep.mubr.bf16.mxu0 %v2179_v6  ;;  %1331 = vmatpush1.bf16.msra.mxu0 %v1322_v18 }
  0xd9   : > { %1903 = vmatprep.subr.msk.bf16.mxu0 %vm287_vm1, %v1467_v19 }
  0xdd   : > { %1965 = vmatmul.mubr.msk.bf16.vlgmr.msra.gmra.mrb[8].mxu1 %vm280_vm3, %v2145_v63 }
  0xde   : > { %1969 = vmatpush3.bf16.msra.mxu1 %v1022_v21  ;;  %1970 = vmatprep.mubr.msk.bf16.mxu1 %vm280_vm3, %v2146_v4 }
  0xdf   : > { %2094 = vmatprep.subr.msk.bf16.mxu1 %vm287_vm1, %v2378_v59  ;;  %1883 = vmatmul.mubr.msk.bf16.gmra.mrb[4].mxu0 %vm280_vm3, %v2149_v20 }
  0xe0   : > { %1362 = vmatprep.mubr.bf16.mxu0 %v2179_v6 }
  0xe7   : > { %1893 = vmatmul.mubr.msk.bf16.vlgmr.msra.gmra.mrb[0].mxu0 %vm280_vm3, %v2150_v23 }
  0xe8   : > { %1372 = vmatprep.mubr.bf16.mxu0 %v2179_v6  ;;  %1484 = vmatpush1.bf16.msra.mxu0 %v1475_v24 }
  0xe9   : > { %1971 = vmatmul.mubr.msk.bf16.vlgmr.msra.gmra.mrb[8].mxu1 %vm280_vm3, %v2147_v11 }
  0xea   : > { %1975 = vmatpush3.bf16.msra.mxu1 %v1175_v25  ;;  %1976 = vmatprep.mubr.msk.bf16.mxu1 %vm280_vm3, %v2148_v15 }
  0xeb   : > { %2095 = vmatprep.subr.msk.bf16.mxu1 %vm287_vm1, %v1311_v5 }
  0xef   : > { %1894 = vmatmul.mubr.msk.bf16.gmra.mrb[4].mxu0 %vm280_vm3, %v2151_v26 }
  0xf0   : > { %1515 = vmatprep.mubr.bf16.mxu0 %v2179_v6 }
  0xf5   : > { %1977 = vmatmul.mubr.msk.bf16.vlgmr.msra.gmra.mrb[8].mxu1 %vm280_vm3, %v2149_v20 }
  0xf6   : > { %1981 = vmatpush3.bf16.msra.mxu1 %v1328_v28  ;;  %1982 = vmatprep.mubr.msk.bf16.mxu1 %vm280_vm3, %v2150_v23 }
  0xf7   : > { %2096 = vmatprep.subr.msk.bf16.mxu1 %vm287_vm1, %v1464_v17  ;;  %1904 = vmatmul.mubr.msk.bf16.vlgmr.msra.gmra.mrb[0].mxu0 %vm280_vm3, %v2152_v27 }
  0xf8   : > { %1525 = vmatprep.mubr.bf16.mxu0 %v2179_v6  ;;  %v2188_v6 = vmov 0.0  }
  0xf9   : > { %230 = vst.msk [vmem:[%s2483_s8] sm:$0xff] %vm229_vm10, %v2188_v6  ;;  %231 = vst.msk [vmem:[%s2483_s8 + $0x8] sm:$0xff] %vm229_vm10, %v2188_v6 }
  0xfa   : > { %232 = vst.msk [vmem:[%s2483_s8 + $0x10] sm:$0xff] %vm229_vm10, %v2188_v6  ;;  %233 = vst.msk [vmem:[%s2483_s8 + $0x18] sm:$0xff] %vm229_vm10, %v2188_v6 }
  0xff   : > { %1905 = vmatmul.mubr.msk.bf16.gmra.mrb[4].mxu0 %vm280_vm3, %v2153_v29 }
 0x101   : > { %1983 = vmatmul.mubr.msk.bf16.vlgmr.msra.gmra.mrb[8].mxu1 %vm280_vm3, %v2151_v26  ;;  %v1650_v26 = vand.u32 127, %v259_v0 }
 0x102   : > { %1987 = vmatpush3.bf16.msra.mxu1 %v1481_v30  ;;  %1988 = vmatprep.mubr.msk.bf16.mxu1 %vm280_vm3, %v2152_v27 }
 0x103   : > { %v1652_v6 = vadd.s32 256, %v1650_v26 }
 0x105   : > { %vm1657_vm11 = vcmp.lt.s32.totalorder %v1652_v6, 288 }
 0x10d   : > { %1989 = vmatmul.mubr.msk.bf16.vlgmr.msra.gmra.mrb[8].mxu1 %vm280_vm3, %v2153_v29 }
 0x17c   : > { %v458_v31 = vpop.f32.mrb[0].mxu1 }
 0x17d   : > { %v460_v32 = vpop.f32.mrb[1].mxu1 }
 0x17e   : > { %v462_v33 = vpop.f32.mrb[2].mxu1 }
 0x17f   : > { %v464_v34 = vpop.f32.mrb[3].mxu1 }
 0x184   : > { %v468_v35 = vpop.f32.mrb[4].mxu1 }
 0x185   : > { %v470_v36 = vpop.f32.mrb[5].mxu1 }
 0x186   : > { %v472_v37 = vpop.f32.mrb[6].mxu1 }
 0x187   : > { %v474_v38 = vpop.f32.mrb[7].mxu1 }
 0x1ca   : > { %v1517_v40 = vpop.f32.mrb[0].mxu0 }
 0x1cb   : > { %v1992_v44 = vadd.f32 %v1517_v40, %v458_v31  ;;  %v1519_v45 = vpop.f32.mrb[1].mxu0  ;;  %v1682_v31 = vsub.s32 2, %v2235_v3 }
 0x1cc   : > { %v1993_v46 = vadd.f32 %v1519_v45, %v460_v32  ;;  %v1521_v47 = vpop.f32.mrb[2].mxu0 }
 0x1cd   : > { %v1621_v49 = vadd.f32 %v1992_v44, %v1604_v41  ;;  %v1994_v50 = vadd.f32 %v1521_v47, %v462_v33  ;;  %v1523_v51 = vpop.f32.mrb[3].mxu0 }
 0x1ce   : > { %v1622_v53 = vadd.f32 %v1993_v46, %v1604_v41  ;;  %v1995_v54 = vadd.f32 %v1523_v51, %v464_v34 }
 0x1cf   : > { %v1633_v56 = vmax.f32 %v1621_v49, 0.0  ;;  %v1624_v57 = vadd.f32 %v1994_v50, %v1609_v48 }
 0x1d0   : > { %v1634_v58 = vmax.f32 %v1622_v53, 0.0  ;;  %v1625_v59 = vadd.f32 %v1995_v54, %v1609_v48 }
 0x1d1   : > { %v1636_v60 = vmax.f32 %v1624_v57, 0.0  ;;  %v1687_v61 = vmul.f32 %v1675_v52, %v1633_v56 }
 0x1d2   : > { %v1637_v62 = vmax.f32 %v1625_v59, 0.0  ;;  %v1527_v63 = vpop.f32.mrb[4].mxu0  ;;  %v1688_v2 = vmul.f32 %v1679_v55, %v1634_v58 }
 0x1d3   : > { %v1996_v4 = vadd.f32 %v1527_v63, %v468_v35  ;;  %v1529_v5 = vpop.f32.mrb[5].mxu0  ;;  %v1690_v7 = vmul.f32 %v1675_v52, %v1636_v60  ;;  %v1699_v60 = vld [vmem:[%s2483_s8] sm:$0xff] }
 0x1d4   : > { %v1997_v8 = vadd.f32 %v1529_v5, %v470_v36  ;;  %v1531_v9 = vpop.f32.mrb[6].mxu0  ;;  %v1703_v11 = vadd.f32 %v1688_v2, %v1687_v61  ;;  %v1691_v12 = vmul.f32 %v1679_v55, %v1637_v62  ;;  %v1683_v36 = vrot.slane %v1670_v42, %v1682_v31  ;;  %v1700_v62 = vld [vmem:[%s2483_s8 + $0x8] sm:$0xff]  ;;  %v1702_v2 = vld [vmem:[%s2483_s8 + $0x18] sm:$0xff] }
 0x1d5   : > { %v1998_v13 = vadd.f32 %v1531_v9, %v472_v37  ;;  %v1627_v14 = vadd.f32 %v1996_v4, %v1614_v1  ;;  %v1533_v15 = vpop.f32.mrb[7].mxu0 }
 0x1d6   : > { %v1628_v16 = vadd.f32 %v1997_v8, %v1614_v1  ;;  %v1999_v17 = vadd.f32 %v1533_v15, %v474_v38  ;;  %v1709_v18 = vadd.f32 %v1691_v12, %v1690_v7  ;;  %v1701_v7 = vld [vmem:[%s2483_s8 + $0x10] sm:$0xff] }
 0x1d7   : > { %v1639_v19 = vmax.f32 %v1627_v14, 0.0  ;;  %v1630_v20 = vadd.f32 %v1998_v13, %v1619_v10 }
 0x1d8   : > { %v1640_v21 = vmax.f32 %v1628_v16, 0.0  ;;  %v1631_v22 = vadd.f32 %v1999_v17, %v1619_v10 }
 0x1d9   : > { %v1642_v23 = vmax.f32 %v1630_v20, 0.0  ;;  %v1693_v24 = vmul.f32 %v1675_v52, %v1639_v19 }
 0x1da   : > { %v1643_v25 = vmax.f32 %v1631_v22, 0.0  ;;  %v1694_v27 = vmul.f32 %v1679_v55, %v1640_v21 }
 0x1db   : > { %v1696_v28 = vmul.f32 %v1675_v52, %v1642_v23 }
 0x1dc   : > { %v1697_v29 = vmul.f32 %v1679_v55, %v1643_v25  ;;  %v1714_v30 = vadd.f32 %v1694_v27, %v1693_v24 }
 0x1de   : > { %v1719_v32 = vadd.f32 %v1697_v29, %v1696_v28 }
 0x1e0   : > { %v1990_v33 = vpop.f32.mrb[8].mxu1 }
 0x1e1   : > { %v1629_v34 = vadd.f32 %v1990_v33, %v1614_v1  ;;  %v1570_v35 = vpop.f32.mrb[9].mxu1 }
 0x1e2   : > { %v1623_v37 = vadd.f32 %v1604_v41, %v1570_v35  ;;  %v1991_v38 = vpop.f32.mrb[10].mxu1 }
 0x1e3   : > { %v1641_v39 = vmax.f32 %v1629_v34, 0.0  ;;  %v1632_v40 = vadd.f32 %v1991_v38, %v1619_v10  ;;  %v1573_v43 = vpop.f32.mrb[11].mxu1 }
 0x1e4   : > { %v1635_v44 = vmax.f32 %v1623_v37, 0.0  ;;  %v1626_v0 = vadd.f32 %v1609_v48, %v1573_v43 }
 0x1e5   : > { %v1666_v45 = vsel %vm1657_vm11, %v1641_v39, 0.0  ;;  %v1644_v46 = vmax.f32 %v1632_v40, 0.0 }
 0x1e6   : > { %v1695_v47 = vmul.f32 %v1683_v36, %v1666_v45  ;;  %v1660_v3 = vsel %vm1657_vm11, %v1635_v44, 0.0  ;;  %v1638_v49 = vmax.f32 %v1626_v0, 0.0 }
 0x1e7   : > { %v1689_v50 = vmul.f32 %v1683_v36, %v1660_v3  ;;  %v1669_v51 = vsel %vm1657_vm11, %v1644_v46, 0.0 }
 0x1e8   : > { %v1698_v42 = vmul.f32 %v1683_v36, %v1669_v51  ;;  %v1663_v41 = vsel %vm1657_vm11, %v1638_v49, 0.0  ;;  %v1715_v52 = vsel %vm1704_vm12, %v1695_v47, 0.0 }
 0x1e9   : > { %v1692_v53 = vmul.f32 %v1683_v36, %v1663_v41  ;;  %v1705_v54 = vsel %vm1704_vm12, %v1689_v50, 0.0  ;;  %v1716_v48 = vadd.f32 %v1715_v52, %v1714_v30 }
 0x1ea   : > { %v1706_v55 = vadd.f32 %v1705_v54, %v1703_v11  ;;  %v1720_v56 = vsel %vm1704_vm12, %v1698_v42, 0.0 }
 0x1eb   : > { %v1710_v57 = vsel %vm1704_vm12, %v1692_v53, 0.0  ;;  %v1721_v58 = vadd.f32 %v1720_v56, %v1719_v32 }
 0x1ec   : > { %1707 = vadd.xlane.f32.xlu1 %v1706_v55  ;;  %v1711_v59 = vadd.f32 %v1710_v57, %v1709_v18 }
 0x1ee   : > { %1712 = vadd.xlane.f32.xlu0 %v1711_v59 }
 0x1f0   : > { %1722 = vadd.xlane.f32.xlu1 %v1721_v58 }
 0x1f2   : > { %1717 = vadd.xlane.f32.xlu0 %v1716_v48 }
 0x279   : > { %v1708_v61 = vpop.xlane.xlu1 %1707 }
 0x27a   : > { %v1724_v63 = vadd.f32 %v1708_v61, %v1699_v60 }
 0x27b   : > { %v1713_v1 = vpop.xlane.xlu0 %1712 }
 0x27c   : > { %1729 = vst.msk [vmem:[%s2483_s8] sm:$0xff] %vm229_vm10, %v1724_v63  ;;  %v1725_v4 = vadd.f32 %v1713_v1, %v1700_v62 }
 0x27d   : > { %v1723_v5 = vpop.xlane.xlu1 %1722 }
 0x27e   : > { %1730 = vst.msk [vmem:[%s2483_s8 + $0x8] sm:$0xff] %vm229_vm10, %v1725_v4  ;;  %v1727_v8 = vadd.f32 %v1723_v5, %v1702_v2 }
 0x27f   : > { %v1718_v9 = vpop.xlane.xlu0 %1717 }
 0x280   : > { %1732 = vst.msk [vmem:[%s2483_s8 + $0x18] sm:$0xff] %vm229_vm10, %v1727_v8  ;;  %v1726_v10 = vadd.f32 %v1718_v9, %v1701_v7 }
 0x282   : > { %1731 = vst.msk [vmem:[%s2483_s8 + $0x10] sm:$0xff] %vm229_vm10, %v1726_v10 }
 0x283 PF: > { %s14_s17 = sadd.s32 1, %s2176_s17   ;;  %s2530_s15 = smov %s2172_s16 }
 0x284   : > { %p11_p5 = scmp.ge.s32.totalorder %s14_s17, 6   ;;  %s2531_s16 = smov %s2533_s18 }
 0x286   :  { %13 = sbr.rel (!%p11_p5) target bundleno = 2 (0x2), region = 78 }

</bundles_post_ra>
